<compile_context>
chip_gen: v5e
topology: v5e:2x2
jax: 0.10.0
libtpu: 0.0.40
codegen_flags: <defaults>
</compile_context>

<pallas_src>
import numpy as np
import jax
import jax.numpy as jnp
from jax.experimental import pallas as pl
from jax.experimental.pallas import tpu as pltpu


_VMEM = pl.BlockSpec(memory_space=pltpu.MemorySpace.VMEM)
_SMEM = pl.BlockSpec(memory_space=pltpu.MemorySpace.SMEM)


def _prelu(v, p):
    return jnp.where(v > 0, v, p * v)


def _round_up(x, m):
    return ((int(x) + m - 1) // m) * m


# ----------------------------------------------------------------------------
# Kernel 1: fused node gating for BOTH node sets
# ----------------------------------------------------------------------------
def _gate_kernel(x1_ref, r2_ref, x2_ref, r1_ref,
                 g1w1a_ref, g1w1b_ref, g1b1_ref, g1w2_ref,
                 g2w1a_ref, g2w1b_ref, g2b1_ref, g2w2_ref,
                 sc_ref, o1_ref, o2_ref):
    """out_k = x_k * sigmoid(w2_k . PReLU(x_k @ w1a_k + readout @ w1b_k + b1_k) + b2_k)."""
    p1, b2_1, p2, b2_2 = sc_ref[0], sc_ref[1], sc_ref[2], sc_ref[3]

    h1 = (jnp.dot(x1_ref[...], g1w1a_ref[...], preferred_element_type=jnp.float32)
          + jnp.dot(r2_ref[...], g1w1b_ref[...], preferred_element_type=jnp.float32)
          + g1b1_ref[...])
    h1 = _prelu(h1, p1)
    s1 = jax.nn.sigmoid(jnp.sum(h1 * g1w2_ref[...], axis=-1, keepdims=True) + b2_1)
    o1_ref[...] = x1_ref[...] * s1

    h2 = (jnp.dot(x2_ref[...], g2w1a_ref[...], preferred_element_type=jnp.float32)
          + jnp.dot(r1_ref[...], g2w1b_ref[...], preferred_element_type=jnp.float32)
          + g2b1_ref[...])
    h2 = _prelu(h2, p2)
    s2 = jax.nn.sigmoid(jnp.sum(h2 * g2w2_ref[...], axis=-1, keepdims=True) + b2_2)
    o2_ref[...] = x2_ref[...] * s2


def gate_pallas(x_1, r2n, x_2, r1n, g1, g2, C):
    N1, N2 = x_1.shape[0], x_2.shape[0]
    scal = jnp.stack([g1["p"][0, 0], g1["b2"][0, 0], g2["p"][0, 0], g2["b2"][0, 0]])
    return pl.pallas_call(
        _gate_kernel,
        out_shape=(jax.ShapeDtypeStruct((N1, C), jnp.float32),
                   jax.ShapeDtypeStruct((N2, C), jnp.float32)),
        in_specs=[_VMEM] * 12 + [_SMEM],
        out_specs=(_VMEM, _VMEM),
    )(x_1, r2n, x_2, r1n,
      g1["w1"][:C], g1["w1"][C:], g1["b1"], g1["w2"].T,
      g2["w1"][:C], g2["w1"][C:], g2["b1"], g2["w2"].T,
      scal)


# ----------------------------------------------------------------------------
# Kernel 2: pair MLP + per-graph segmented reduction, grid over pair tiles
# ----------------------------------------------------------------------------
def _pair_kernel(ps_ref,
                 x1_ref, x2_ref, seg_ref, inter_ref,
                 w1a_ref, w1b_ref, b1_ref, w2_ref, b2_ref, w3_ref, b3_ref,
                 out_ref):
    p0, p1, p2 = ps_ref[0], ps_ref[1], ps_ref[2]

    # PReLU(concat(x1p, x2p)) @ w1 == PReLU(x1p) @ w1[:C] + PReLU(x2p) @ w1[C:]
    h = (jnp.dot(_prelu(x1_ref[...], p0), w1a_ref[...], preferred_element_type=jnp.float32)
         + jnp.dot(_prelu(x2_ref[...], p0), w1b_ref[...], preferred_element_type=jnp.float32)
         + b1_ref[...])
    h = _prelu(h, p1)
    h = jnp.dot(h, w2_ref[...], preferred_element_type=jnp.float32) + b2_ref[...]
    h = _prelu(h, p2)
    # `a` is folded into w3/b3 by the wrapper.
    ans = jnp.dot(h, w3_ref[...], preferred_element_type=jnp.float32) + b3_ref[...]   # [TP, C]

    # Segmented reduction over graphs inside the tile (pad rows carry seg == Bp -> drop).
    seg = seg_ref[0, 0, :]                                         # [TP] int32
    bp, tp = inter_ref.shape[0], seg.shape[0]
    onehot = (jax.lax.broadcasted_iota(jnp.int32, (bp, tp), 0)
              == seg[None, :]).astype(jnp.float32)                 # [Bp, TP]
    pooled = jnp.dot(onehot, ans, preferred_element_type=jnp.float32)   # [Bp, C]
    contrib = jnp.sum(pooled * inter_ref[...], axis=-1)            # [Bp]
    out_ref[...] = contrib[None, None, :]                          # lane-dense (1, 1, Bp) store


def pair_mlp_pallas(x1p_pad, x2p_pad, seg3, inter_pad, mlp, a, TP):
    P_pad, C = x1p_pad.shape
    T = P_pad // TP
    Bp = inter_pad.shape[0]
    two_c = 2 * C

    w1a, w1b = mlp["w1"][:C], mlp["w1"][C:]
    w3a = mlp["w3"] * a                     # fold `a` (column scale) into last linear
    b3a = mlp["b3"] * a
    ps = jnp.stack([mlp["p0"][0, 0], mlp["p1"][0, 0], mlp["p2"][0, 0]])

    grid_spec = pltpu.PrefetchScalarGridSpec(
        num_scalar_prefetch=1,
        grid=(T,),
        in_specs=[
            pl.BlockSpec((TP, C), lambda t, _s: (t, 0)),         # x1p tile
            pl.BlockSpec((TP, C), lambda t, _s: (t, 0)),         # x2p tile
            pl.BlockSpec((1, 1, TP), lambda t, _s: (t, 0, 0)),   # segment ids
            pl.BlockSpec((Bp, C), lambda t, _s: (0, 0)),         # inter (resident)
            pl.BlockSpec((C, two_c), lambda t, _s: (0, 0)),      # w1a
            pl.BlockSpec((C, two_c), lambda t, _s: (0, 0)),      # w1b
            pl.BlockSpec((1, two_c), lambda t, _s: (0, 0)),      # b1
            pl.BlockSpec((two_c, C), lambda t, _s: (0, 0)),      # w2
            pl.BlockSpec((1, C), lambda t, _s: (0, 0)),          # b2
            pl.BlockSpec((C, C), lambda t, _s: (0, 0)),          # w3 * a
            pl.BlockSpec((1, C), lambda t, _s: (0, 0)),          # b3 * a
        ],
        out_specs=pl.BlockSpec((1, 1, Bp), lambda t, _s: (t, 0, 0)),
    )
    return pl.pallas_call(
        _pair_kernel,
        grid_spec=grid_spec,
        out_shape=jax.ShapeDtypeStruct((T, 1, Bp), jnp.float32),
        compiler_params=pltpu.CompilerParams(dimension_semantics=("parallel",)),
    )(ps, x1p_pad, x2p_pad, seg3, inter_pad,
      w1a, w1b, mlp["b1"], mlp["w2"], mlp["b2"], w3a, b3a)


# ----------------------------------------------------------------------------
# Module wrapper (data-dependent index construction stays host/XLA side)
# ----------------------------------------------------------------------------
def interactions_forward(params, x_1, x_2, inter, d_1, d_2):
    """d_1, d_2 are static numpy int arrays (nodes per graph)."""
    B, C = inter.shape
    d_1 = np.asarray(d_1)
    d_2 = np.asarray(d_2)

    batch_1 = np.repeat(np.arange(B), d_1)
    batch_2 = np.repeat(np.arange(B), d_2)

    # global_add_pool ([B, C], tiny) + broadcast of the *other* set's readout
    r1 = jax.ops.segment_sum(x_1, jnp.asarray(batch_1), num_segments=B)
    r2 = jax.ops.segment_sum(x_2, jnp.asarray(batch_2), num_segments=B)
    r2n = jnp.repeat(r2, d_1, axis=0)      # [N1, C] aligned with x_1 rows
    r1n = jnp.repeat(r1, d_2, axis=0)      # [N2, C] aligned with x_2 rows

    # fused node gating (single launch, both sets, no [N, 2C] concat)
    x_1g, x_2g = gate_pallas(x_1, r2n, x_2, r1n,
                             params["weight_1"], params["weight_2"], C)

    # pairwise index construction (static, host side)
    s_1 = np.cumsum(d_1)
    s_2 = np.cumsum(d_2)
    ind_1_list, ind_2_list = [], []
    for e, (i, j) in enumerate(zip(d_1, d_2)):
        off1 = s_1[e - 1] if e else 0
        off2 = s_2[e - 1] if e else 0
        ind_1_list.append(np.repeat(np.arange(i), j) + off1)
        ind_2_list.append(np.tile(np.arange(j), i) + off2)
    ind_1 = np.concatenate(ind_1_list).astype(np.int32)
    ind_2 = np.concatenate(ind_2_list).astype(np.int32)
    size_1_2 = d_1 * d_2
    P = int(size_1_2.sum())
    batch_ans = np.repeat(np.arange(B), size_1_2)

    # pair tiling: fixed TP rows per grid step, tail padded (seg id = Bp -> dropped)
    TP = min(256, _round_up(max(P, 1), 8))
    P_pad = _round_up(P, TP)
    T = P_pad // TP
    Bp = _round_up(max(B, 1), 128)

    ind1_pad = np.zeros(P_pad, np.int32); ind1_pad[:P] = ind_1
    ind2_pad = np.zeros(P_pad, np.int32); ind2_pad[:P] = ind_2
    seg_pad = np.full(P_pad, Bp, np.int32); seg_pad[:P] = batch_ans
    seg3 = jnp.asarray(seg_pad.reshape(T, 1, TP))

    # gathered gated pair features (module outputs -> materialized once, no concat)
    x1p_pad = jnp.take(x_1g, jnp.asarray(ind1_pad), axis=0)   # [P_pad, C]
    x2p_pad = jnp.take(x_2g, jnp.asarray(ind2_pad), axis=0)   # [P_pad, C]

    inter_pad = jnp.zeros((Bp, C), jnp.float32).at[:B, :].set(inter)

    partials = pair_mlp_pallas(x1p_pad, x2p_pad, seg3, inter_pad,
                               params["mlp"], params["a"], TP)  # [T, 1, Bp]
    logit = jnp.sum(partials, axis=(0, 1))[:B]

    return logit, x1p_pad[:P], x2p_pad[:P]


# ----------------------------------------------------------------------------
# Pure-JAX reference (same math, no Pallas) for a sanity check
# ----------------------------------------------------------------------------
def _ref_forward(params, x_1, x_2, inter, d_1, d_2):
    def prelu(v, p):
        return jnp.where(v > 0, v, p[0, 0] * v)

    B = inter.shape[0]
    d_1 = np.asarray(d_1); d_2 = np.asarray(d_2)
    batch_1 = np.repeat(np.arange(B), d_1)
    batch_2 = np.repeat(np.arange(B), d_2)
    r1 = jax.ops.segment_sum(x_1, jnp.asarray(batch_1), num_segments=B)
    r2 = jax.ops.segment_sum(x_2, jnp.asarray(batch_2), num_segments=B)
    r1 = jnp.repeat(r1, d_2, axis=0)
    r2 = jnp.repeat(r2, d_1, axis=0)
    s1 = jnp.concatenate([x_1, r2], axis=1)
    s2 = jnp.concatenate([x_2, r1], axis=1)

    def gate(g, xs, x):
        h = xs @ g["w1"] + g["b1"]
        h = prelu(h, g["p"])
        s = jax.nn.sigmoid(h @ g["w2"] + g["b2"])
        return x * s

    x1g = gate(params["weight_1"], s1, x_1)
    x2g = gate(params["weight_2"], s2, x_2)

    c1 = np.cumsum(d_1); c2 = np.cumsum(d_2)
    i1, i2 = [], []
    for e, (i, j) in enumerate(zip(d_1, d_2)):
        i1.append(np.repeat(np.arange(i), j) + (c1[e - 1] if e else 0))
        i2.append(np.tile(np.arange(j), i) + (c2[e - 1] if e else 0))
    x1p = x1g[jnp.asarray(np.concatenate(i1))]
    x2p = x2g[jnp.asarray(np.concatenate(i2))]
    inputs = jnp.concatenate([x1p, x2p], axis=1)
    size_1_2 = d_1 * d_2
    m = params["mlp"]
    h = prelu(inputs, m["p0"])
    h = prelu(h @ m["w1"] + m["b1"], m["p1"])
    h = prelu(h @ m["w2"] + m["b2"], m["p2"])
    h = h @ m["w3"] + m["b3"]
    ans = params["a"] * h
    per_pair = jnp.sum(ans * jnp.repeat(inter, size_1_2, axis=0), axis=-1)
    batch_ans = jnp.asarray(np.repeat(np.arange(B), size_1_2))
    logit = jax.ops.segment_sum(per_pair, batch_ans, num_segments=B)
    return logit, x1p, x2p


# ----------------------------------------------------------------------------
# Deterministic parameter initialization
# ----------------------------------------------------------------------------
def _linear(key, fan_in, fan_out):
    k1, k2 = jax.random.split(key)
    bound = 1.0 / np.sqrt(fan_in)
    w = jax.random.uniform(k1, (fan_in, fan_out), jnp.float32, -bound, bound)
    b = jax.random.uniform(k2, (1, fan_out), jnp.float32, -bound, bound)
    return w, b


def init_params(key, C):
    ks = jax.random.split(key, 8)
    prelu0 = jnp.full((1, 1), 0.25, jnp.float32)  # default nn.PReLU() init

    mw1, mb1 = _linear(ks[0], 2 * C, 2 * C)
    mw2, mb2 = _linear(ks[1], 2 * C, C)
    mw3, mb3 = _linear(ks[2], C, C)
    mlp = dict(p0=prelu0, w1=mw1, b1=mb1, p1=prelu0, w2=mw2, b2=mb2,
               p2=prelu0, w3=mw3, b3=mb3)

    def gate_params(k):
        ka, kb = jax.random.split(k)
        w1, b1 = _linear(ka, 2 * C, C)
        w2, b2 = _linear(kb, C, 1)
        return dict(w1=w1, b1=b1, p=prelu0, w2=w2, b2=b2)

    weight_1 = gate_params(ks[3])
    weight_2 = gate_params(ks[4])

    # glorot init of `a` viewed as (1, C)
    ga_bound = np.sqrt(6.0 / (1 + C))
    a = jax.random.uniform(ks[5], (1, C), jnp.float32, -ga_bound, ga_bound)

    # self.bias exists in __init__ but is unused in forward; kept for fidelity.
    bias = jnp.zeros((C,), jnp.float32)

    return dict(mlp=mlp, weight_1=weight_1, weight_2=weight_2, a=a, bias=bias)


# ----------------------------------------------------------------------------
if __name__ == "__main__":
    key = jax.random.PRNGKey(0)
    C = 16                      # in_channels
    B = 2                       # number of graph pairs
    d_1 = np.array([3, 5])      # nodes per graph (set 1)  -> N1 = 8
    d_2 = np.array([4, 4])      # nodes per graph (set 2)  -> N2 = 8
    N1, N2 = int(d_1.sum()), int(d_2.sum())

    kx1, kx2, ki, kp = jax.random.split(key, 4)
    x_1 = jax.random.normal(kx1, (N1, C), jnp.float32)
    x_2 = jax.random.normal(kx2, (N2, C), jnp.float32)
    inter = jax.random.normal(ki, (B, C), jnp.float32)

    params = init_params(kp, C)

    logit, x1p, x2p = interactions_forward(params, x_1, x_2, inter, d_1, d_2)
    jax.block_until_ready((logit, x1p, x2p))

    # sanity check against a pure-JAX reference
    ref_logit, ref_x1p, ref_x2p = _ref_forward(params, x_1, x_2, inter, d_1, d_2)
    np.testing.assert_allclose(np.asarray(logit), np.asarray(ref_logit), rtol=1e-2, atol=1e-2)
    np.testing.assert_allclose(np.asarray(x1p), np.asarray(ref_x1p), rtol=1e-2, atol=1e-2)
    np.testing.assert_allclose(np.asarray(x2p), np.asarray(ref_x2p), rtol=1e-2, atol=1e-2)

    print("KERNEL_OK")
</pallas_src>

<mosaic_0001>
module attributes {stable_mosaic.version = 11 : i64} {
  func.func @_gate_kernel(%arg0: memref<8x16xf32, #tpu.memory_space<vmem>>, %arg1: memref<8x16xf32, #tpu.memory_space<vmem>>, %arg2: memref<8x16xf32, #tpu.memory_space<vmem>>, %arg3: memref<8x16xf32, #tpu.memory_space<vmem>>, %arg4: memref<16x16xf32, #tpu.memory_space<vmem>>, %arg5: memref<16x16xf32, #tpu.memory_space<vmem>>, %arg6: memref<1x16xf32, #tpu.memory_space<vmem>>, %arg7: memref<1x16xf32, #tpu.memory_space<vmem>>, %arg8: memref<16x16xf32, #tpu.memory_space<vmem>>, %arg9: memref<16x16xf32, #tpu.memory_space<vmem>>, %arg10: memref<1x16xf32, #tpu.memory_space<vmem>>, %arg11: memref<1x16xf32, #tpu.memory_space<vmem>>, %arg12: memref<4xf32, #tpu.memory_space<smem>>, %arg13: memref<8x16xf32, #tpu.memory_space<vmem>>, %arg14: memref<8x16xf32, #tpu.memory_space<vmem>>) attributes {dimension_semantics = [], scalar_prefetch = 0 : i64, scratch_operands = 0 : i64, tpu.core_type = #tpu.core_type<tc>} {
    %c0 = arith.constant 0 : index
    %0 = memref.load %arg12[%c0] : memref<4xf32, #tpu.memory_space<smem>>
    %c1 = arith.constant 1 : index
    %1 = memref.load %arg12[%c1] : memref<4xf32, #tpu.memory_space<smem>>
    %c2 = arith.constant 2 : index
    %2 = memref.load %arg12[%c2] : memref<4xf32, #tpu.memory_space<smem>>
    %c3 = arith.constant 3 : index
    %3 = memref.load %arg12[%c3] : memref<4xf32, #tpu.memory_space<smem>>
    %c0_0 = arith.constant 0 : index
    %c0_1 = arith.constant 0 : index
    %4 = vector.load %arg0[%c0_0, %c0_1] : memref<8x16xf32, #tpu.memory_space<vmem>>, vector<8x16xf32>
    %c0_2 = arith.constant 0 : index
    %c0_3 = arith.constant 0 : index
    %5 = vector.load %arg4[%c0_2, %c0_3] : memref<16x16xf32, #tpu.memory_space<vmem>>, vector<16x16xf32>
    %cst = arith.constant dense<0.000000e+00> : vector<8x16xf32>
    %6 = tpu.matmul %4, %5, %cst {dimension_numbers = #tpu.dot_dimension_numbers<[1], [0], [0], [1], [0, 0, 1, 1], [], []>} : vector<8x16xf32>, vector<16x16xf32>, vector<8x16xf32> -> vector<8x16xf32>
    %c0_4 = arith.constant 0 : index
    %c0_5 = arith.constant 0 : index
    %7 = vector.load %arg1[%c0_4, %c0_5] : memref<8x16xf32, #tpu.memory_space<vmem>>, vector<8x16xf32>
    %c0_6 = arith.constant 0 : index
    %c0_7 = arith.constant 0 : index
    %8 = vector.load %arg5[%c0_6, %c0_7] : memref<16x16xf32, #tpu.memory_space<vmem>>, vector<16x16xf32>
    %cst_8 = arith.constant dense<0.000000e+00> : vector<8x16xf32>
    %9 = tpu.matmul %7, %8, %cst_8 {dimension_numbers = #tpu.dot_dimension_numbers<[1], [0], [0], [1], [0, 0, 1, 1], [], []>} : vector<8x16xf32>, vector<16x16xf32>, vector<8x16xf32> -> vector<8x16xf32>
    %10 = arith.addf %6, %9 : vector<8x16xf32>
    %c0_9 = arith.constant 0 : index
    %c0_10 = arith.constant 0 : index
    %11 = vector.load %arg6[%c0_9, %c0_10] : memref<1x16xf32, #tpu.memory_space<vmem>>, vector<1x16xf32>
    %12 = vector.broadcast %11 : vector<1x16xf32> to vector<8x16xf32>
    %13 = arith.addf %10, %12 : vector<8x16xf32>
    %cst_11 = arith.constant 0.000000e+00 : f32
    %14 = vector.broadcast %cst_11 : f32 to vector<8x16xf32>
    %15 = arith.cmpf ogt, %13, %14 : vector<8x16xf32>
    %16 = vector.broadcast %0 : f32 to vector<8x16xf32>
    %17 = arith.mulf %16, %13 : vector<8x16xf32>
    %18 = arith.select %15, %13, %17 : vector<8x16xi1>, vector<8x16xf32>
    %c0_12 = arith.constant 0 : index
    %c0_13 = arith.constant 0 : index
    %19 = vector.load %arg7[%c0_12, %c0_13] : memref<1x16xf32, #tpu.memory_space<vmem>>, vector<1x16xf32>
    %20 = vector.broadcast %19 : vector<1x16xf32> to vector<8x16xf32>
    %21 = arith.mulf %18, %20 : vector<8x16xf32>
    %cst_14 = arith.constant dense<0.000000e+00> : vector<8xf32>
    %22 = vector.multi_reduction <add>, %21, %cst_14 [1] : vector<8x16xf32> to vector<8xf32>
    %23 = vector.shape_cast %22 : vector<8xf32> to vector<8x1xf32>
    %24 = vector.broadcast %1 : f32 to vector<8x1xf32>
    %25 = arith.addf %23, %24 : vector<8x1xf32>
    %26 = arith.negf %25 : vector<8x1xf32>
    %27 = math.exp %26 : vector<8x1xf32>
    %cst_15 = arith.constant 1.000000e+00 : f32
    %28 = vector.broadcast %cst_15 : f32 to vector<8x1xf32>
    %29 = arith.addf %28, %27 : vector<8x1xf32>
    %30 = arith.divf %28, %29 : vector<8x1xf32>
    %c0_16 = arith.constant 0 : index
    %c0_17 = arith.constant 0 : index
    %31 = vector.load %arg0[%c0_16, %c0_17] : memref<8x16xf32, #tpu.memory_space<vmem>>, vector<8x16xf32>
    %32 = vector.broadcast %30 : vector<8x1xf32> to vector<8x16xf32>
    %33 = arith.mulf %31, %32 : vector<8x16xf32>
    %c0_18 = arith.constant 0 : index
    %c0_19 = arith.constant 0 : index
    %34 = vector.load %arg13[%c0_18, %c0_19] : memref<8x16xf32, #tpu.memory_space<vmem>>, vector<8x16xf32>
    tpu.vector_store %arg13[%c0_18, %c0_19], %33 {strides = array<i32>} : memref<8x16xf32, #tpu.memory_space<vmem>>, vector<8x16xf32>,
    %c0_20 = arith.constant 0 : index
    %c0_21 = arith.constant 0 : index
    %35 = vector.load %arg2[%c0_20, %c0_21] : memref<8x16xf32, #tpu.memory_space<vmem>>, vector<8x16xf32>
    %c0_22 = arith.constant 0 : index
    %c0_23 = arith.constant 0 : index
    %36 = vector.load %arg8[%c0_22, %c0_23] : memref<16x16xf32, #tpu.memory_space<vmem>>, vector<16x16xf32>
    %cst_24 = arith.constant dense<0.000000e+00> : vector<8x16xf32>
    %37 = tpu.matmul %35, %36, %cst_24 {dimension_numbers = #tpu.dot_dimension_numbers<[1], [0], [0], [1], [0, 0, 1, 1], [], []>} : vector<8x16xf32>, vector<16x16xf32>, vector<8x16xf32> -> vector<8x16xf32>
    %c0_25 = arith.constant 0 : index
    %c0_26 = arith.constant 0 : index
    %38 = vector.load %arg3[%c0_25, %c0_26] : memref<8x16xf32, #tpu.memory_space<vmem>>, vector<8x16xf32>
    %c0_27 = arith.constant 0 : index
    %c0_28 = arith.constant 0 : index
    %39 = vector.load %arg9[%c0_27, %c0_28] : memref<16x16xf32, #tpu.memory_space<vmem>>, vector<16x16xf32>
    %cst_29 = arith.constant dense<0.000000e+00> : vector<8x16xf32>
    %40 = tpu.matmul %38, %39, %cst_29 {dimension_numbers = #tpu.dot_dimension_numbers<[1], [0], [0], [1], [0, 0, 1, 1], [], []>} : vector<8x16xf32>, vector<16x16xf32>, vector<8x16xf32> -> vector<8x16xf32>
    %41 = arith.addf %37, %40 : vector<8x16xf32>
    %c0_30 = arith.constant 0 : index
    %c0_31 = arith.constant 0 : index
    %42 = vector.load %arg10[%c0_30, %c0_31] : memref<1x16xf32, #tpu.memory_space<vmem>>, vector<1x16xf32>
    %43 = vector.broadcast %42 : vector<1x16xf32> to vector<8x16xf32>
    %44 = arith.addf %41, %43 : vector<8x16xf32>
    %cst_32 = arith.constant 0.000000e+00 : f32
    %45 = vector.broadcast %cst_32 : f32 to vector<8x16xf32>
    %46 = arith.cmpf ogt, %44, %45 : vector<8x16xf32>
    %47 = vector.broadcast %2 : f32 to vector<8x16xf32>
    %48 = arith.mulf %47, %44 : vector<8x16xf32>
    %49 = arith.select %46, %44, %48 : vector<8x16xi1>, vector<8x16xf32>
    %c0_33 = arith.constant 0 : index
    %c0_34 = arith.constant 0 : index
    %50 = vector.load %arg11[%c0_33, %c0_34] : memref<1x16xf32, #tpu.memory_space<vmem>>, vector<1x16xf32>
    %51 = vector.broadcast %50 : vector<1x16xf32> to vector<8x16xf32>
    %52 = arith.mulf %49, %51 : vector<8x16xf32>
    %cst_35 = arith.constant dense<0.000000e+00> : vector<8xf32>
    %53 = vector.multi_reduction <add>, %52, %cst_35 [1] : vector<8x16xf32> to vector<8xf32>
    %54 = vector.shape_cast %53 : vector<8xf32> to vector<8x1xf32>
    %55 = vector.broadcast %3 : f32 to vector<8x1xf32>
    %56 = arith.addf %54, %55 : vector<8x1xf32>
    %57 = arith.negf %56 : vector<8x1xf32>
    %58 = math.exp %57 : vector<8x1xf32>
    %cst_36 = arith.constant 1.000000e+00 : f32
    %59 = vector.broadcast %cst_36 : f32 to vector<8x1xf32>
    %60 = arith.addf %59, %58 : vector<8x1xf32>
    %61 = arith.divf %59, %60 : vector<8x1xf32>
    %c0_37 = arith.constant 0 : index
    %c0_38 = arith.constant 0 : index
    %62 = vector.load %arg2[%c0_37, %c0_38] : memref<8x16xf32, #tpu.memory_space<vmem>>, vector<8x16xf32>
    %63 = vector.broadcast %61 : vector<8x1xf32> to vector<8x16xf32>
    %64 = arith.mulf %62, %63 : vector<8x16xf32>
    %c0_39 = arith.constant 0 : index
    %c0_40 = arith.constant 0 : index
    %65 = vector.load %arg14[%c0_39, %c0_40] : memref<8x16xf32, #tpu.memory_space<vmem>>, vector<8x16xf32>
    tpu.vector_store %arg14[%c0_39, %c0_40], %64 {strides = array<i32>} : memref<8x16xf32, #tpu.memory_space<vmem>>, vector<8x16xf32>,
    return
  }
}

</mosaic_0001>

<bundles_post_ra>
// kernel: tpu_custom_call.1
= control target key start
LH: loop header
LB: loop body
LE: loop exit
PB: predicated region body
PF: predicated region fallthrough
CT: control target
= control target key end

     0   :  { %20 = vsyncpa [#allocation3], 0  ;;  %s868_s0 = inlined_call_operand.hbm [shape: f32[8,16], index: 0, kind: input, shape index: {}]   ;;  %s869_s1 = inlined_call_operand.hbm [shape: f32[8,16], index: 1, kind: input, shape index: {}]   ;;  %s870_s2 = inlined_call_operand.hbm [shape: f32[8,16], index: 2, kind: input, shape index: {}]   ;;  %s871_s3 = inlined_call_operand.hbm [shape: f32[8,16], index: 3, kind: input, shape index: {}]   ;;  %s872_s4 = inlined_call_operand.hbm [shape: f32[16,16], index: 4, kind: input, shape index: {}]   ;;  %s873_s5 = inlined_call_operand.hbm [shape: f32[16,16], index: 5, kind: input, shape index: {}]   ;;  %s874_s6 = inlined_call_operand.vmem [shape: f32[1,16], index: 6, kind: input, shape index: {}]   ;;  %s875_s7 = inlined_call_operand.vmem [shape: f32[1,16], index: 7, kind: input, shape index: {}]   ;;  %s876_s8 = inlined_call_operand.hbm [shape: f32[16,16], index: 8, kind: input, shape index: {}]   ;;  %s877_s9 = inlined_call_operand.hbm [shape: f32[16,16], index: 9, kind: input, shape index: {}]   ;;  %s878_s10 = inlined_call_operand.vmem [shape: f32[1,16], index: 10, kind: input, shape index: {}]   ;;  %s879_s11 = inlined_call_operand.vmem [shape: f32[1,16], index: 11, kind: input, shape index: {}]   ;;  %s880_s12 = inlined_call_operand.vmem [shape: f32[4], index: 12, kind: input, shape index: {}]   ;;  %s881_s13 = inlined_call_operand.hbm [shape: f32[8,16], index: 13, kind: output, shape index: {0}]   ;;  %s882_s14 = inlined_call_operand.hbm [shape: f32[8,16], index: 14, kind: output, shape index: {1}]  }
   0x1   :  { %21 = vsyncpa [#allocation7], 0 }
   0x2   :  { %22 = vsyncpa [#allocation10], 0 }
   0x3   :  { %23 = vsyncpa [#allocation13], 0 }
   0x4   :  { %24 = vsyncpa [#allocation16], 0 }
   0x5   :  { %25 = vsyncpa [#allocation5], 0 }
   0x6   :  { %26 = vsyncpa [#allocation4], 0  ;;  %s44_s15 = sshll.u32 %s869_s1, 4  ;;  %s45_s15 = int_to_ptr.hbm [resolvable:$true] %s44_s15 }
   0x7   :  { %27 = vsyncpa [#allocation20], 0  ;;  %s707_s16 = smov [#allocation6]   ;;  %s66_s20 = sshll.u32 %s871_s3, 4  ;;  %s67_s20 = int_to_ptr.hbm [resolvable:$true] %s66_s20 }
   0x8   :  { %s46_s17 = sshll.u32 %s707_s16, 4  ;;  %s708_s21 = smov [#allocation9]   ;;  %s47_s17 = int_to_ptr.vmem [resolvable:$true] %s46_s17 }
   0x9   :  { %49 = dma.hbm_to_vmem [thread:$0]  %s45_s15, 128, %s47_s17, [#allocation7]  }
   0xa   :  { %s68_s22 = sshll.u32 %s708_s21, 4  ;;  %s89_s25 = sshll.u32 %s873_s5, 4  ;;  %s69_s22 = int_to_ptr.vmem [resolvable:$true] %s68_s22  ;;  %s90_s25 = int_to_ptr.hbm [resolvable:$true] %s89_s25 }
   0xb   :  { %71 = dma.hbm_to_vmem [thread:$0]  %s67_s20, 128, %s69_s22, [#allocation10]  }
   0xc   :  { %s709_s1 = smov [#allocation12]   ;;  %s33_s29 = sshll.u32 %s868_s0, 4  ;;  %s34_s29 = int_to_ptr.hbm [resolvable:$true] %s33_s29 }
   0xd   :  { %s91_s26 = sshll.u32 %s709_s1, 4  ;;  %s710_s30 = smov 128   ;;  %s92_s26 = int_to_ptr.vmem [resolvable:$true] %s91_s26 }
   0xe   :  { %s711_s3 = smov 8   ;;  %s712_s15 = smov [#allocation2]  }
   0xf   :  { %97 = dma.hbm_to_vmem [thread:$0]  %s90_s25, 256, %s92_s26, [#allocation13], %s710_s30, %s710_s30, %s711_s3  }
  0x10   :  { %s35_s16 = sshll.u32 %s712_s15, 4  ;;  %s55_s5 = sshll.u32 %s870_s2, 4  ;;  %s36_s16 = int_to_ptr.vmem [resolvable:$true] %s35_s16  ;;  %s56_s5 = int_to_ptr.hbm [resolvable:$true] %s55_s5 }
  0x11   :  { %38 = dma.hbm_to_vmem [thread:$0]  %s34_s29, 128, %s36_s16, [#allocation3]  }
  0x12   :  { %s76_s0 = sshll.u32 %s872_s4, 4  ;;  %s713_s21 = smov [#allocation8]   ;;  %s77_s0 = int_to_ptr.hbm [resolvable:$true] %s76_s0 }
  0x13   :  { %s57_s22 = sshll.u32 %s713_s21, 4  ;;  %s714_s23 = smov [#allocation11]   ;;  %s58_s22 = int_to_ptr.vmem [resolvable:$true] %s57_s22 }
  0x14   :  { %60 = dma.hbm_to_vmem [thread:$0]  %s56_s5, 128, %s58_s22, [#allocation7]  }
  0x15   :  { %s78_s24 = sshll.u32 %s714_s23, 4  ;;  %s106_s26 = sshll.u32 %s876_s8, 4  ;;  %s79_s24 = int_to_ptr.vmem [resolvable:$true] %s78_s24  ;;  %s107_s26 = int_to_ptr.hbm [resolvable:$true] %s106_s26 }
  0x16   :  { %84 = dma.hbm_to_vmem [thread:$0]  %s77_s0, 256, %s79_s24, [#allocation10], %s710_s30, %s710_s30, %s711_s3  }
  0x17   :  { %s119_s4 = sshll.u32 %s877_s9, 4  ;;  %s715_s28 = smov [#allocation14]   ;;  %s120_s4 = int_to_ptr.hbm [resolvable:$true] %s119_s4 }
  0x18   :  { %s108_s29 = sshll.u32 %s715_s28, 4  ;;  %s716_s15 = smov [#allocation15]   ;;  %s109_s29 = int_to_ptr.vmem [resolvable:$true] %s108_s29 }
  0x19   :  { %114 = dma.hbm_to_vmem [thread:$0]  %s107_s26, 256, %s109_s29, [#allocation13], %s710_s30, %s710_s30, %s711_s3  }
  0x1a   :  { %s121_s8 = sshll.u32 %s716_s15, 4  ;;  %s137_s18 = sshll.u32 %s880_s12, 4  ;;  %s122_s8 = int_to_ptr.vmem [resolvable:$true] %s121_s8  ;;  %s138_s18 = int_to_ptr.vmem [resolvable:$true] %s137_s18 }
  0x1b   :  { %127 = dma.hbm_to_vmem [thread:$0]  %s120_s4, 256, %s122_s8, [#allocation16], %s710_s30, %s710_s30, %s711_s3  }
  0x1c   :  { %s717_s9 = smov [#allocation17]  }
  0x1d   :  { %140 = dma.vmem_to_smem %s138_s18, 16, %s717_s9, [#allocation5]  }
  0x1e   :  { %691 = dma.done.wait [#allocation3], 128  }
  0x1f   :  { %692 = vsyncadd [#allocation3], 4294967168 }
  0x20   :  { %693 = dma.done.wait [#allocation7], 256  }
  0x21   :  { %694 = vsyncadd [#allocation7], 4294967040 }
  0x22   :  { %695 = dma.done.wait [#allocation10], 384  }
  0x23   :  { %696 = vsyncadd [#allocation10], 4294966912 }
  0x24   :  { %697 = dma.done.wait [#allocation13], 512  }
  0x25   :  { %698 = vsyncadd [#allocation13], 4294966784 }
  0x26   :  { %699 = dma.done.wait [#allocation16], 256  }
  0x27   :  { %700 = vsyncadd [#allocation16], 4294967040 }
  0x28   :  { %701 = dma.done.wait [#allocation5], 16  }
  0x29   :  { %702 = vsyncadd [#allocation5], 4294967280 }
  0x2a   :  { %177 = sfence }
  0x2b   :  { %v187_v0 = vld [vmem:[#allocation12 + $0x8] sm:$0xff]  ;;  %v184_v1 = vld [vmem:[#allocation11 + $0x8] sm:$0xff]  ;;  %v186_v4 = vld [vmem:[#allocation12] sm:$0xff]  ;;  %vm188_vm0 = vcmask 130048   ;;  %s178_s12 = sld [smem:[#allocation17]]  ;;  %s374_s1 = sshll.u32 %s881_s13, 4  ;;  %s375_s1 = int_to_ptr.hbm [resolvable:$true] %s374_s1 }
  0x2c   :  { %v280_v2 = vld [vmem:[#allocation15 + $0x8] sm:$0xff]  ;;  %206 = vmatpush.msra.mxu0 %v187_v0  ;;  %229 = vmatpush.msra.mxu1 %v184_v1  ;;  %v277_v3 = vld [vmem:[#allocation14 + $0x8] sm:$0xff]  ;;  %v183_v5 = vld [vmem:[#allocation11] sm:$0xff]  ;;  %s406_s5 = sld [smem:[#allocation17 + $0x2]]  ;;  %s719_s13 = smov [#allocation19]  }
  0x2d   :  { %298 = vmatpush.msra.mxu2 %v280_v2  ;;  %321 = vmatpush.msra.mxu3 %v277_v3  ;;  %v279_v6 = vld [vmem:[#allocation15] sm:$0xff]  ;;  %v276_v7 = vld [vmem:[#allocation14] sm:$0xff]  ;;  %v185_v8 = vld [vmem:[#allocation6] sm:$0xff]  ;;  %s383_s26 = sshll.u32 %s719_s13, 4  ;;  %s385_s4 = sshll.u32 %s882_s14, 4  ;;  %s384_s26 = int_to_ptr.vmem [resolvable:$true] %s383_s26  ;;  %s386_s4 = int_to_ptr.hbm [resolvable:$true] %s385_s4 }
  0x2e   :  { %207 = vmatpush.msra.mxu0 %v186_v4  ;;  %230 = vmatpush.msra.mxu1 %v183_v5  ;;  %v834_v9 = vld [vmem:[#allocation2] sm:$0xff]  ;;  %v278_v10 = vld [vmem:[#allocation9] sm:$0xff]  ;;  %v836_v11 = vld [vmem:[#allocation8] sm:$0xff] }
  0x2f   :  { %299 = vmatpush.msra.mxu2 %v279_v6  ;;  %322 = vmatpush.msra.mxu3 %v276_v7  ;;  %v427_v12 = vld [vmem:[%s874_s6] ss:$0 sm:$0xff] }
  0x30   :  { %408 = vmatmul.msk.f32.vlgmr.msra.gmra.mxu0 %vm188_vm0, %v185_v8  ;;  %409 = vmatmul.msk.f32.vlgmr.msra.gmra.mxu1 %vm188_vm0, %v834_v9  ;;  %v429_v18 = vld [vmem:[%s875_s7] ss:$0 sm:$0xff]  ;;  %s405_s7 = sld [smem:[#allocation17 + $0x1]] }
  0x31   :  { %411 = vmatmul.msk.f32.vlgmr.msra.gmra.mxu2 %vm188_vm0, %v278_v10  ;;  %412 = vmatmul.msk.f32.vlgmr.msra.gmra.mxu3 %vm188_vm0, %v836_v11  ;;  %v241_v16 = vstv %s178_s12  ;;  %v428_v20 = vld [vmem:[%s878_s10] ss:$0 sm:$0xff]  ;;  %s407_s10 = sld [smem:[#allocation17 + $0x3]] }
  0x32   :  { %v333_v26 = vstv %s406_s5  ;;  %v430_v29 = vld [vmem:[%s879_s11] ss:$0 sm:$0xff]  ;;  %s718_s11 = smov [#allocation18]  }
  0x33   :  { %s372_s23 = sshll.u32 %s718_s11, 4  ;;  %s373_s23 = int_to_ptr.vmem [resolvable:$true] %s372_s23 }
  0x36   :  { %v252_v34 = vstv %s405_s7 }
  0x37   :  { %v344_v38 = vstv %s407_s10 }
  0xad   :  { %v209_v13 = vpop.f32.mrf.mxu0  ;;  %v232_v14 = vpop.f32.mrf.mxu1 }
  0xae   :  { %v233_v15 = vadd.f32 %v232_v14, %v209_v13 }
  0xb0   :  { %v239_v17 = vadd.f32 %v427_v12, %v233_v15 }
  0xb2   :  { %v242_v19 = vmul.f32 %v241_v16, %v239_v17  ;;  %vm240_vm1 = vcmp.gt.f32.partialorder %v239_v17, 0.0 }
  0xb4   :  { %v301_v21 = vpop.f32.mrf.mxu2  ;;  %v324_v22 = vpop.f32.mrf.mxu3  ;;  %v243_v23 = vsel %vm240_vm1, %v239_v17, %v242_v19 }
  0xb5   :  { %v325_v24 = vadd.f32 %v324_v22, %v301_v21  ;;  %v248_v25 = vmul.f32 %v429_v18, %v243_v23 }
  0xb7   :  { %v331_v27 = vadd.f32 %v428_v20, %v325_v24  ;;  %v249_v28 = vsel %vm188_vm0, %v248_v25, 0.0 }
  0xb8   :  { %250 = vadd.xlane.f32.xlu0 %v249_v28 }
  0xb9   :  { %v334_v30 = vmul.f32 %v333_v26, %v331_v27  ;;  %vm332_vm2 = vcmp.gt.f32.partialorder %v331_v27, 0.0 }
  0xbb   :  { %v335_v31 = vsel %vm332_vm2, %v331_v27, %v334_v30 }
  0xbc   :  { %v340_v32 = vmul.f32 %v430_v29, %v335_v31 }
  0xbe   :  { %v341_v33 = vsel %vm188_vm0, %v340_v32, 0.0 }
  0xc0   :  { %342 = vadd.xlane.f32.xlu0 %v341_v33 }
 0x12b   :  { %v251_v35 = vpop.xlane.xlu0 %250 }
 0x12c   :  { %v253_v36 = vadd.f32 %v252_v34, %v251_v35 }
 0x12e   :  { %v410_v37 = vmul.f32 -1.442695, %v253_v36 }
 0x130   :  { %431 = vpow2.f32 %v410_v37 }
 0x133   :  { %v343_v39 = vpop.xlane.xlu0 %342 }
 0x134   :  { %v345_v40 = vadd.f32 %v344_v38, %v343_v39 }
 0x136   :  { %v432_v41 = vpop.eup %431  ;;  %v413_v42 = vmul.f32 -1.442695, %v345_v40 }
 0x137   :  { %v257_v43 = vadd.f32 1.0, %v432_v41 }
 0x138   :  { %433 = vpow2.f32 %v413_v42 }
 0x139   :  { %435 = vrcp.f32 %v257_v43  ;;  %v269_v49 = vand.u32 2147483648, %v257_v43  ;;  %v267_v51 = vand.u32 2147483647, %v257_v43  ;;  %vm263_vm4 = vweird.f32 %v257_v43 }
 0x13b   :  { %v270_v54 = vor.u32 1.1754944e-38, %v269_v49  ;;  %vm268_vm6 = vcmp.eq.f32.partialorder %v267_v51, 8.507059e+37 }
 0x13e   :  { %v434_v44 = vpop.eup %433 }
 0x13f   :  { %v436_v45 = vpop.eup %435  ;;  %v349_v46 = vadd.f32 1.0, %v434_v44 }
 0x140   :  { %v259_v47 = vmul.f32 %v436_v45, %v257_v43  ;;  %vm264_vm3 = vweird.f32 %v436_v45 }
 0x141   :  { %437 = vrcp.f32 %v349_v46  ;;  %vm265_vm5 = vmor %vm263_vm4, %vm264_vm3  ;;  %v361_v60 = vand.u32 2147483648, %v349_v46  ;;  %v359_v62 = vand.u32 2147483647, %v349_v46  ;;  %vm355_vm8 = vweird.f32 %v349_v46 }
 0x142   :  { %v260_v48 = vsub.f32 1.0, %v259_v47 }
 0x143   :  { %v362_v0 = vor.u32 1.1754944e-38, %v361_v60  ;;  %vm360_vm10 = vcmp.eq.f32.partialorder %v359_v62, 8.507059e+37 }
 0x144   :  { %v261_v50 = vmul.f32 %v436_v45, %v260_v48 }
 0x146   :  { %v262_v52 = vadd.f32 %v436_v45, %v261_v50 }
 0x147   :  { %v438_v53 = vpop.eup %437 }
 0x148   :  { %v351_v55 = vmul.f32 %v438_v53, %v349_v46  ;;  %v266_v56 = vsel %vm265_vm5, %v436_v45, %v262_v52  ;;  %vm356_vm7 = vweird.f32 %v438_v53 }
 0x149   :  { %v271_v57 = vsel %vm268_vm6, %v270_v54, %v266_v56  ;;  %vm357_vm9 = vmor %vm355_vm8, %vm356_vm7 }
 0x14a   :  { %v273_v58 = vmul.f32 %v271_v57, %v834_v9  ;;  %v352_v59 = vsub.f32 1.0, %v351_v55 }
 0x14c   :  { %274 = vst.msk [vmem:[#allocation18] sm:$0xff] %vm188_vm0, %v273_v58  ;;  %v353_v61 = vmul.f32 %v438_v53, %v352_v59 }
 0x14d   :  { %377 = dma.vmem_to_hbm [thread:$0]  %s373_s23, 128, %s375_s1, [#allocation4]  }
 0x14e   :  { %v354_v63 = vadd.f32 %v438_v53, %v353_v61 }
 0x150   :  { %v358_v1 = vsel %vm357_vm9, %v438_v53, %v354_v63 }
 0x151   :  { %v363_v2 = vsel %vm360_vm10, %v362_v0, %v358_v1 }
 0x152   :  { %v365_v3 = vmul.f32 %v363_v2, %v836_v11 }
 0x154   :  { %366 = vst.msk [vmem:[#allocation19] sm:$0xff] %vm188_vm0, %v365_v3 }
 0x155   :  { %388 = dma.vmem_to_hbm [thread:$0]  %s384_s26, 128, %s386_s4, [#allocation20]  }
 0x156   :  { %703 = dma.done.wait [#allocation4], 128  }
 0x157   :  { %704 = vsyncadd [#allocation4], 4294967168 }
 0x158   :  { %705 = dma.done.wait [#allocation20], 128  }
 0x159   :  { %706 = vsyncadd [#allocation20], 4294967168 }
 0x15a   :  { %397 = vsyncpa [#allocation3], 1 }
 0x15b   :  { %398 = vsyncpa [#allocation7], 1 }
 0x15c   :  { %399 = vsyncpa [#allocation10], 1 }
 0x15d   :  { %400 = vsyncpa [#allocation13], 1 }
 0x15e   :  { %401 = vsyncpa [#allocation16], 1 }
 0x15f   :  { %402 = vsyncpa [#allocation4], 1 }
 0x160   :  { %403 = vsyncpa [#allocation20], 1 }
 0x161   :  { %404 = vsyncpa [#allocation5], 1 }

</bundles_post_ra>
